<compile_context>
chip_gen: v5e
topology: v5e:2x2
jax: 0.10.0
libtpu: 0.0.40
codegen_flags: <defaults>
</compile_context>

<pallas_src>
import functools

import jax
import jax.numpy as jnp
from jax.experimental import pallas as pl
from jax.experimental.pallas import tpu as pltpu


def _round_up(x: int, m: int) -> int:
    return ((x + m - 1) // m) * m


def _largest_aligned_divisor(n: int, cap: int, align: int) -> int:
    """Largest d with d % align == 0, d | n, d <= cap. Requires n % align == 0."""
    best = align
    d = align
    limit = min(cap, n)
    while d <= limit:
        if n % d == 0:
            best = d
        d += align
    return best


# --------------------------------------------------------------------------
# Kernels
# --------------------------------------------------------------------------
def _linear_kernel_single_k(x_ref, w_ref, b_ref, z_ref, *, compute_dtype):
    """One (i, j) tile with the full K dim in one block: z = x @ W + b."""
    z_ref[...] = (
        jnp.dot(
            x_ref[...].astype(compute_dtype),
            w_ref[...].astype(compute_dtype),
            preferred_element_type=jnp.float32,
        )
        + b_ref[...]
    )


def _linear_kernel_multi_k(x_ref, w_ref, b_ref, z_ref, *, compute_dtype):
    """(i, j, k) tile: accumulate straight into the k-invariant f32 output block."""
    k = pl.program_id(2)

    part = jnp.dot(
        x_ref[...].astype(compute_dtype),
        w_ref[...].astype(compute_dtype),
        preferred_element_type=jnp.float32,
    )

    @pl.when(k == 0)
    def _init():
        z_ref[...] = part

    @pl.when(k > 0)
    def _accum():
        z_ref[...] += part

    @pl.when(k == pl.num_programs(2) - 1)
    def _bias():
        z_ref[...] += b_ref[...]


# --------------------------------------------------------------------------
# Wrapper
# --------------------------------------------------------------------------
_VMEM_LIMIT = 48 * 1024 * 1024          # safe on v5e/v6e (128 MiB) and v7x (64 MiB)
_FAST_PATH_BYTES = 24 * 1024 * 1024     # whole problem as one VMEM block


@functools.partial(jax.jit, static_argnames=("use_bf16",))
def softmax_regression_forward(x, W, b, *, use_bf16: bool = False):
    """Linear logits z = x @ W + b (forward of SoftmaxRegression).

    x: (batch, p) f32, W: (p, c) f32, b: (c,) f32  ->  z: (batch, c) f32.
    use_bf16=True casts x/W tiles to bf16 in-kernel for the MXU (f32 accum).
    """
    batch, p = x.shape
    p_w, c = W.shape
    assert p == p_w and b.shape == (c,)

    compute_dtype = jnp.bfloat16 if use_bf16 else jnp.float32
    b2 = b.reshape(1, c)

    # ---------------- fast path: one grid-less block, zero padding ----------
    vmem_est = 4 * (batch * p + p * c + batch * c + c)
    if batch <= 1024 and p <= 2048 and c <= 1024 and vmem_est <= _FAST_PATH_BYTES:
        return pl.pallas_call(
            functools.partial(_linear_kernel_single_k, compute_dtype=compute_dtype),
            out_shape=jax.ShapeDtypeStruct((batch, c), jnp.float32),
            compiler_params=pltpu.CompilerParams(vmem_limit_bytes=_VMEM_LIMIT),
        )(x, W, b2)

    # ---------------- tiled path ---------------------------------------------
    # M: pad batch to a multiple of 8 sublanes only (<= 7 extra rows).
    M = _round_up(batch, 8)

    # N: small c -> one full-width block (no padding of W/b/c); large c -> pad
    # to a 128-lane multiple and tile lane-dense.
    if c <= 512:
        N, tn = c, c
    else:
        N = _round_up(c, 128)
        tn = _largest_aligned_divisor(N, 512, 128)
    grid_n = N // tn

    # K: moderate p -> collapse the reduction axis into one block (no
    # accumulation, no p padding).  Large p -> pad to 128 and tile.
    if p <= 2048:
        K, tk = p, p
    else:
        K = _round_up(p, 128)
        tk = _largest_aligned_divisor(K, 1024, 128)
    grid_k = K // tk

    # tm: biggest multiple-of-8 divisor of M under the cap; if the grid would
    # otherwise have a single "parallel" block, split M >= 2 ways so both v7x
    # TensorCores get work.
    tm_cap = 1024
    if grid_n == 1 and M > 512:
        tm_cap = min(tm_cap, M // 2)
    tm = _largest_aligned_divisor(M, tm_cap, 8)
    grid_m = M // tm

    # Minimal padding; skipped entirely when shapes are already aligned.
    x_p = x if (M == batch and K == p) else jnp.pad(x, ((0, M - batch), (0, K - p)))
    w_p = W if (K == p and N == c) else jnp.pad(W, ((0, K - p), (0, N - c)))
    b_p = b2 if N == c else jnp.pad(b2, ((0, 0), (0, N - c)))

    # Advisory scheduler hint (counts the actual per-block re-reads).
    bytes_accessed = (
        M * K * 4 * grid_n          # x streamed once per N block
        + K * N * 4 * grid_m        # W streamed once per M block
        + N * 4 * grid_m * grid_n   # bias
        + M * N * 4                 # z written once
    )
    cost = pl.CostEstimate(
        flops=2 * M * N * K, transcendentals=0, bytes_accessed=bytes_accessed
    )

    if grid_k == 1:
        # No reduction axis: plain tiled z = x @ W + b, no init/finalize.
        z_p = pl.pallas_call(
            functools.partial(_linear_kernel_single_k, compute_dtype=compute_dtype),
            out_shape=jax.ShapeDtypeStruct((M, N), jnp.float32),
            grid_spec=pltpu.PrefetchScalarGridSpec(
                num_scalar_prefetch=0,
                grid=(grid_m, grid_n),
                in_specs=[
                    pl.BlockSpec((tm, tk), lambda i, j: (i, 0)),   # x tile
                    pl.BlockSpec((tk, tn), lambda i, j: (0, j)),   # W tile
                    pl.BlockSpec((1, tn), lambda i, j: (0, j)),    # bias tile
                ],
                out_specs=pl.BlockSpec((tm, tn), lambda i, j: (i, j)),
            ),
            compiler_params=pltpu.CompilerParams(
                dimension_semantics=("parallel", "parallel"),
                vmem_limit_bytes=_VMEM_LIMIT,
            ),
            cost_estimate=cost,
        )(x_p, w_p, b_p)
    else:
        # K innermost ("arbitrary"); output block is k-invariant -> accumulate
        # directly into it (no VMEM scratch, no epilogue copy).
        # TODO(synk): add pipeline_mode=pl.Buffered(3) on the x spec if
        # profiling shows exposed DMA at K-step boundaries.
        z_p = pl.pallas_call(
            functools.partial(_linear_kernel_multi_k, compute_dtype=compute_dtype),
            out_shape=jax.ShapeDtypeStruct((M, N), jnp.float32),
            grid_spec=pltpu.PrefetchScalarGridSpec(
                num_scalar_prefetch=0,
                grid=(grid_m, grid_n, grid_k),
                in_specs=[
                    pl.BlockSpec((tm, tk), lambda i, j, k: (i, k)),   # x tile
                    pl.BlockSpec((tk, tn), lambda i, j, k: (k, j)),   # W tile
                    pl.BlockSpec((1, tn), lambda i, j, k: (0, j)),    # bias tile
                ],
                out_specs=pl.BlockSpec((tm, tn), lambda i, j, k: (i, j)),
            ),
            compiler_params=pltpu.CompilerParams(
                dimension_semantics=("parallel", "parallel", "arbitrary"),
                vmem_limit_bytes=_VMEM_LIMIT,
            ),
            cost_estimate=cost,
        )(x_p, w_p, b_p)

    if M == batch and N == c:
        return z_p            # aligned case: no extra HBM slice-copy
    return z_p[:batch, :c]


# --------------------------------------------------------------------------
# Demo / self-check
# --------------------------------------------------------------------------
if __name__ == "__main__":
    key = jax.random.PRNGKey(0)
    kx1, kw1, kx2, kw2, kb2, kx3, kw3, kb3 = jax.random.split(key, 8)

    # ---- small demo shapes (module spec: x (batch, p), W (p, c), b (c,)) ----
    batch, p, c = 8, 32, 16
    x = jax.random.normal(kx1, (batch, p), dtype=jnp.float32)
    W = jax.random.normal(kw1, (p, c), dtype=jnp.float32) / p
    b = jnp.zeros((c,), dtype=jnp.float32)

    z_ref = jnp.dot(x, W, precision=jax.lax.Precision.HIGHEST) + b

    z = jax.block_until_ready(softmax_regression_forward(x, W, b))
    assert z.shape == (batch, c)
    assert jnp.allclose(z, z_ref, atol=2e-3, rtol=2e-3)

    # bf16 MXU path (opt-in): looser tolerance for the in-kernel cast.
    z_bf16 = jax.block_until_ready(softmax_regression_forward(x, W, b, use_bf16=True))
    assert z_bf16.shape == (batch, c)
    assert jnp.allclose(z_bf16, z_ref, atol=2e-2, rtol=2e-2)

    # ---- tiled path, collapsed K (batch > single-block cap, small c) --------
    batch2, p2, c2 = 1152, 200, 12
    x2 = jax.random.normal(kx2, (batch2, p2), dtype=jnp.float32)
    W2 = jax.random.normal(kw2, (p2, c2), dtype=jnp.float32) / p2
    b2 = jax.random.normal(kb2, (c2,), dtype=jnp.float32)
    z2_ref = jnp.dot(x2, W2, precision=jax.lax.Precision.HIGHEST) + b2
    z2 = jax.block_until_ready(softmax_regression_forward(x2, W2, b2))
    assert z2.shape == (batch2, c2)
    assert jnp.allclose(z2, z2_ref, atol=2e-3, rtol=2e-3)

    # ---- tiled path, multi-K accumulation (large p) --------------------------
    batch3, p3, c3 = 64, 2304, 16
    x3 = jax.random.normal(kx3, (batch3, p3), dtype=jnp.float32)
    W3 = jax.random.normal(kw3, (p3, c3), dtype=jnp.float32) / p3
    b3 = jax.random.normal(kb3, (c3,), dtype=jnp.float32)
    z3_ref = jnp.dot(x3, W3, precision=jax.lax.Precision.HIGHEST) + b3
    z3 = jax.block_until_ready(softmax_regression_forward(x3, W3, b3))
    assert z3.shape == (batch3, c3)
    assert jnp.allclose(z3, z3_ref, atol=2e-3, rtol=2e-3)

    print("KERNEL_OK")
</pallas_src>

<mosaic_0001>
module attributes {stable_mosaic.version = 11 : i64} {
  func.func @_linear_kernel_single_k(%arg0: memref<8x32xf32, #tpu.memory_space<vmem>>, %arg1: memref<32x16xf32, #tpu.memory_space<vmem>>, %arg2: memref<1x16xf32, #tpu.memory_space<vmem>>, %arg3: memref<8x16xf32, #tpu.memory_space<vmem>>) attributes {dimension_semantics = [], scalar_prefetch = 0 : i64, scratch_operands = 0 : i64, tpu.core_type = #tpu.core_type<tc>} {
    %c0 = arith.constant 0 : index
    %c0_0 = arith.constant 0 : index
    %0 = vector.load %arg0[%c0, %c0_0] : memref<8x32xf32, #tpu.memory_space<vmem>>, vector<8x32xf32>
    %c0_1 = arith.constant 0 : index
    %c0_2 = arith.constant 0 : index
    %1 = vector.load %arg1[%c0_1, %c0_2] : memref<32x16xf32, #tpu.memory_space<vmem>>, vector<32x16xf32>
    %cst = arith.constant dense<0.000000e+00> : vector<8x16xf32>
    %2 = tpu.matmul %0, %1, %cst {dimension_numbers = #tpu.dot_dimension_numbers<[1], [0], [0], [1], [0, 0, 1, 1], [], []>} : vector<8x32xf32>, vector<32x16xf32>, vector<8x16xf32> -> vector<8x16xf32>
    %c0_3 = arith.constant 0 : index
    %c0_4 = arith.constant 0 : index
    %3 = vector.load %arg2[%c0_3, %c0_4] : memref<1x16xf32, #tpu.memory_space<vmem>>, vector<1x16xf32>
    %4 = vector.broadcast %3 : vector<1x16xf32> to vector<8x16xf32>
    %5 = arith.addf %2, %4 : vector<8x16xf32>
    %c0_5 = arith.constant 0 : index
    %c0_6 = arith.constant 0 : index
    %6 = vector.load %arg3[%c0_5, %c0_6] : memref<8x16xf32, #tpu.memory_space<vmem>>, vector<8x16xf32>
    tpu.vector_store %arg3[%c0_5, %c0_6], %5 {strides = array<i32>} : memref<8x16xf32, #tpu.memory_space<vmem>>, vector<8x16xf32>,
    return
  }
}

</mosaic_0001>

<bundles_post_ra>
// kernel: softmax_regression_forward.1
= control target key start
LH: loop header
LB: loop body
LE: loop exit
PB: predicated region body
PF: predicated region fallthrough
CT: control target
= control target key end

     0   :  { %s137_s0 = inlined_call_operand.vmem [shape: f32[8,32], index: 0, kind: input, shape index: {}]   ;;  %s138_s1 = inlined_call_operand.vmem [shape: f32[32,16], index: 1, kind: input, shape index: {}]   ;;  %s139_s2 = inlined_call_operand.vmem [shape: f32[1,16], index: 2, kind: input, shape index: {}]   ;;  %s140_s3 = inlined_call_operand.hbm [shape: f32[8,16], index: 3, kind: output, shape index: {}]  }
   0x1   :  { %v19_v0 = vld [vmem:[%s138_s1 + $0x18] sm:$0xff]  ;;  %v18_v1 = vld [vmem:[%s138_s1 + $0x10] sm:$0xff]  ;;  %v17_v2 = vld [vmem:[%s138_s1 + $0x8] sm:$0xff] }
   0x2   :  { %40 = vmatpush.msra.mxu0 %v19_v0 }
   0x3   :  { %8 = vsyncpa [#allocation3], 0  ;;  %v16_v3 = vld [vmem:[%s138_s1] sm:$0xff]  ;;  %vm24_vm0 = vcmask 261120   ;;  %s95_s24 = smov [#allocation2]   ;;  %s57_s28 = sshll.u32 %s140_s3, 4  ;;  %s58_s28 = int_to_ptr.hbm [resolvable:$true] %s57_s28 }
   0x4   :  { %41 = vmatpush.msra.mxu0 %v18_v1  ;;  %v15_v4 = vld [vmem:[%s137_s0] sm:$0xff]  ;;  %s55_s25 = sshll.u32 %s95_s24, 4  ;;  %vm48_vm1 = vcmask 130048   ;;  %s56_s25 = int_to_ptr.vmem [resolvable:$true] %s55_s25 }
   0x5   :  { %v68_v5 = vld [vmem:[%s139_s2] ss:$0 sm:$0xff] }
   0x6   :  { %42 = vmatpush.msra.mxu0 %v17_v2 }
   0x8   :  { %43 = vmatpush.msra.mxu0 %v16_v3 }
   0x9   :  { %66 = vmatmul.msk.f32.vlgmr.msra.gmra.mxu0 %vm24_vm0, %v15_v4 }
  0x86   :  { %v45_v6 = vpop.f32.mrf.mxu0 }
  0x87   :  { %v46_v7 = vadd.f32 %v68_v5, %v45_v6 }
  0x89   :  { %49 = vst.msk [vmem:[#allocation2] sm:$0xff] %vm48_vm1, %v46_v7 }
  0x8a   :  { %60 = dma.vmem_to_hbm [thread:$0]  %s56_s25, 128, %s58_s28, [#allocation3]  }
  0x8b   :  { %93 = dma.done.wait [#allocation3], 128  }
  0x8c   :  { %94 = vsyncadd [#allocation3], 4294967168 }
  0x8d   :  { %65 = vsyncpa [#allocation3], 1 }

</bundles_post_ra>
